<compile_context>
chip_gen: v7x
topology: tpu7x:2x2x1
jax: 0.10.0
libtpu: 0.0.40
codegen_flags: <defaults>
</compile_context>

<pallas_src>
import functools

import jax
import jax.numpy as jnp
from jax.experimental import pallas as pl
from jax.experimental.pallas import tpu as pltpu


def _round_up(x, m):
    return ((x + m - 1) // m) * m


def _elastic_loss_kernel(x_ref, t_ref, out_ref, *, k_d2, k_d1, k_x2, k_x1,
                         valid_rows, tb):
    """One grid step: fused elementwise loss on a (tb, D) tile, reduced to a
    lane-dense (8, D) block of partial sums."""
    x = x_ref[...].astype(jnp.float32)
    t = t_ref[...].astype(jnp.float32)
    diff = x - t
    # Fused per-element contribution (constants folded at trace time):
    #   (1-l1)*0.5/D * diff^2 + l1/D * |diff|
    # + alpha*(1-l1)*0.5 * x^2 + alpha*l1 * |x|
    combined = (k_d2 * (diff * diff) + k_d1 * jnp.abs(diff)
                + k_x2 * (x * x) + k_x1 * jnp.abs(x))

    if valid_rows is not None:
        # Ragged batch: rows >= valid_rows in the last tile are padding with
        # unspecified contents (possibly NaN); zero them out. Cheap VPU filler
        # for a memory-bound kernel.
        row = (jax.lax.broadcasted_iota(jnp.int32, (tb, 1), 0)
               + pl.program_id(0) * tb)
        combined = jnp.where(row < valid_rows, combined, 0.0)

    # (tb, D) -> (tb//8, 8, D): sublane-split reshape is layout-free; reducing
    # over the leading axis is plain vreg adds (no XLU sublane reduce).
    d = combined.shape[-1]
    out_ref[...] = combined.reshape(tb // 8, 8, d).sum(axis=0)


def elastic_loss(x, t, *, alpha=0.5, l1_ratio=0.5, reduction="mean", tb=None):
    assert reduction in ("mean", "sum"), (
        "only 'mean'/'sum' are supported")  # TODO(synk): reduction='none' needs a (B,)-shaped per-row output spec.
    assert x.shape == t.shape and x.ndim == 2
    B, D = x.shape
    itemsize = jnp.dtype(x.dtype).itemsize

    # --- tile-size selection (memory-bound: biggest tile that fits VMEM) -----
    if tb is None:
        target_tile_bytes = 4 * 1024 * 1024            # per input, per buffer
        tb = max(8, (target_tile_bytes // (D * itemsize)) // 8 * 8)
        # keep at least 2 tiles when the batch allows it (v7x megacore split)
        tb = min(tb, max(8, _round_up(pl.cdiv(B, 2), 8)))
    else:
        tb = max(8, _round_up(int(tb), 8))

    num_tiles = pl.cdiv(B, tb)
    ragged = (num_tiles * tb != B)        # last tile partially out of bounds

    # --- constant folding -----------------------------------------------------
    c_l2 = (1.0 - float(l1_ratio)) * 0.5
    c_l1 = float(l1_ratio)
    kernel = functools.partial(
        _elastic_loss_kernel,
        k_d2=c_l2 / float(D),
        k_d1=c_l1 / float(D),
        k_x2=float(alpha) * c_l2,
        k_x1=float(alpha) * c_l1,
        valid_rows=B if ragged else None,
        tb=tb,
    )

    # 2 inputs x 2 pipeline buffers x tile + 2 output buffers + headroom.
    tile_bytes = tb * D * itemsize
    needed = 4 * tile_bytes + 2 * 8 * D * 4 + (2 << 20)
    vmem_limit = int(min(max(needed, 16 << 20), 32 << 20))  # safe on v5e/v6e/v7x

    partials = pl.pallas_call(
        kernel,
        out_shape=jax.ShapeDtypeStruct((num_tiles * 8, D), jnp.float32),
        grid_spec=pltpu.PrefetchScalarGridSpec(
            num_scalar_prefetch=0,
            grid=(num_tiles,),
            in_specs=[
                pl.BlockSpec((tb, D), lambda i: (i, 0)),
                pl.BlockSpec((tb, D), lambda i: (i, 0)),
            ],
            out_specs=pl.BlockSpec((8, D), lambda i: (i, 0)),
        ),
        compiler_params=pltpu.CompilerParams(
            dimension_semantics=("parallel",),     # independent tiles -> both TCs on v7x
            vmem_limit_bytes=vmem_limit,
        ),
    )(x, t)

    # Tiny XLA epilogue: every element of `partials` is a genuine partial sum.
    total = jnp.sum(partials)
    if reduction == "mean":
        return total / jnp.float32(B)
    return total


def elastic_loss_ref(x, t, *, alpha=0.5, l1_ratio=0.5, reduction="mean"):
    x = x.astype(jnp.float32)
    t = t.astype(jnp.float32)
    diff = x - t
    loss = (1 - l1_ratio) * 0.5 * diff ** 2 + l1_ratio * jnp.abs(diff)
    alpha_norm = alpha * ((1 - l1_ratio) * 0.5 * x ** 2 + l1_ratio * jnp.abs(x)).sum(axis=1)
    loss = loss.mean(axis=1) + alpha_norm
    if reduction == "mean":
        return loss.mean()
    elif reduction == "sum":
        return loss.sum()
    return loss


if __name__ == "__main__":
    key = jax.random.PRNGKey(0)
    tests = [
        dict(B=16, D=128, dtype=jnp.float32, reduction="mean", tb=None),
        dict(B=13, D=128, dtype=jnp.float32, reduction="sum", tb=None),    # ragged batch -> in-kernel mask
        dict(B=64, D=256, dtype=jnp.float32, reduction="mean", tb=8),      # multi-tile grid path
        dict(B=16, D=128, dtype=jnp.bfloat16, reduction="mean", tb=None),  # bf16 streaming + in-kernel upcast
        dict(B=21, D=128, dtype=jnp.bfloat16, reduction="mean", tb=8),     # ragged + multi-tile + bf16
    ]
    for n, cfg in enumerate(tests):
        key, kx, kt = jax.random.split(key, 3)
        xv = jax.random.normal(kx, (cfg["B"], cfg["D"]), dtype=cfg["dtype"])
        tv = jax.random.normal(kt, (cfg["B"], cfg["D"]), dtype=cfg["dtype"])
        out = elastic_loss(xv, tv, alpha=0.5, l1_ratio=0.5,
                           reduction=cfg["reduction"], tb=cfg["tb"])
        out = jax.block_until_ready(out)
        ref = elastic_loss_ref(xv, tv, alpha=0.5, l1_ratio=0.5,
                               reduction=cfg["reduction"])
        assert jnp.allclose(out, ref, rtol=1e-4, atol=1e-5), (n, out, ref)

    print("KERNEL_OK")
</pallas_src>

<mosaic_0001>
module attributes {stable_mosaic.version = 11 : i64} {
  func.func @_elastic_loss_kernel(%arg0: i32, %arg1: memref<8x128xf32, #tpu.memory_space<vmem>>, %arg2: memref<8x128xf32, #tpu.memory_space<vmem>>, %arg3: memref<8x128xf32, #tpu.memory_space<vmem>>) attributes {dimension_semantics = [#tpu.dimension_semantics<parallel>], iteration_bounds = array<i64: 2>, scalar_prefetch = 0 : i64, scratch_operands = 0 : i64, tpu.core_type = #tpu.core_type<tc>, window_params = [{transform_indices = @transform_0, window_bounds = array<i64: 8, 128>}, {transform_indices = @transform_1, window_bounds = array<i64: 8, 128>}, {transform_indices = @transform_2, window_bounds = array<i64: 8, 128>}]} {
    %c0 = arith.constant 0 : index
    %c0_0 = arith.constant 0 : index
    %0 = vector.load %arg1[%c0, %c0_0] : memref<8x128xf32, #tpu.memory_space<vmem>>, vector<8x128xf32>
    %c0_1 = arith.constant 0 : index
    %c0_2 = arith.constant 0 : index
    %1 = vector.load %arg2[%c0_1, %c0_2] : memref<8x128xf32, #tpu.memory_space<vmem>>, vector<8x128xf32>
    %2 = arith.subf %0, %1 : vector<8x128xf32>
    %3 = arith.mulf %2, %2 : vector<8x128xf32>
    %cst = arith.constant 0.001953125 : f32
    %4 = vector.broadcast %cst : f32 to vector<8x128xf32>
    %5 = arith.mulf %4, %3 : vector<8x128xf32>
    %6 = math.absf %2 : vector<8x128xf32>
    %cst_3 = arith.constant 3.906250e-03 : f32
    %7 = vector.broadcast %cst_3 : f32 to vector<8x128xf32>
    %8 = arith.mulf %7, %6 : vector<8x128xf32>
    %9 = arith.addf %5, %8 : vector<8x128xf32>
    %10 = arith.mulf %0, %0 : vector<8x128xf32>
    %cst_4 = arith.constant 1.250000e-01 : f32
    %11 = vector.broadcast %cst_4 : f32 to vector<8x128xf32>
    %12 = arith.mulf %11, %10 : vector<8x128xf32>
    %13 = arith.addf %9, %12 : vector<8x128xf32>
    %14 = math.absf %0 : vector<8x128xf32>
    %cst_5 = arith.constant 2.500000e-01 : f32
    %15 = vector.broadcast %cst_5 : f32 to vector<8x128xf32>
    %16 = arith.mulf %15, %14 : vector<8x128xf32>
    %17 = arith.addf %13, %16 : vector<8x128xf32>
    %18 = vector.shape_cast %17 : vector<8x128xf32> to vector<1x8x128xf32>
    %cst_6 = arith.constant dense<0.000000e+00> : vector<8x128xf32>
    %19 = vector.multi_reduction <add>, %18, %cst_6 [0] : vector<1x8x128xf32> to vector<8x128xf32>
    %c0_7 = arith.constant 0 : index
    %c0_8 = arith.constant 0 : index
    %20 = vector.load %arg3[%c0_7, %c0_8] : memref<8x128xf32, #tpu.memory_space<vmem>>, vector<8x128xf32>
    tpu.vector_store %arg3[%c0_7, %c0_8], %19 {strides = array<i32>} : memref<8x128xf32, #tpu.memory_space<vmem>>, vector<8x128xf32>,
    return
  }
  func.func @transform_0(%arg0: i32) -> (i32, i32) {
    %c0_i32 = arith.constant 0 : i32
    %c0_i32_0 = arith.constant 0 : i32
    return %arg0, %c0_i32 : i32, i32
  }
  func.func @transform_1(%arg0: i32) -> (i32, i32) {
    %c0_i32 = arith.constant 0 : i32
    %c0_i32_0 = arith.constant 0 : i32
    return %arg0, %c0_i32 : i32, i32
  }
  func.func @transform_2(%arg0: i32) -> (i32, i32) {
    %c0_i32 = arith.constant 0 : i32
    %c0_i32_0 = arith.constant 0 : i32
    return %arg0, %c0_i32 : i32, i32
  }
}

</mosaic_0001>

<bundles_post_ra>
// kernel: tpu_custom_call.1
= control target key start
LH: loop header
LB: loop body
LE: loop exit
PB: predicated region body
PF: predicated region fallthrough
CT: control target
= control target key end

     0   :  { %7 = vsyncpa [#allocation3], 0  ;;  %s744_s0 = inlined_call_operand.hbm [shape: f32[16,128], index: 0, kind: input, shape index: {}]   ;;  %s745_s1 = inlined_call_operand.hbm [shape: f32[16,128], index: 1, kind: input, shape index: {}]   ;;  %s746_s2 = inlined_call_operand.hbm [shape: f32[16,128], index: 2, kind: output, shape index: {}]  }
   0x1   :  { %9 = vsyncpa [#allocation3 + $0x1], 0 }
   0x2   :  { %10 = vsyncpa [#allocation6], 0 }
   0x3   :  { %12 = vsyncpa [#allocation6 + $0x1], 0 }
   0x4   :  { %13 = vsyncpa [#allocation4], 0 }
   0x5   :  { %15 = vsyncpa [#allocation4 + $0x1], 0  ;;  %s535_s9 = smov 0   ;;  %s537_s10 = smov 0  }
   0x6   :  { %s539_s11 = smov 0   ;;  %s541_s12 = smov 0  }
   0x7 LB: > { %s556_s13 = sadd.s32 4294967295, %s515_s12   ;;  %s319_s14 = sadd.s32 4294967294, %s515_s12   ;;  %s515_s12 = sphi %s541_s12, %s765_s12   ;;  %s511_s11 = sphi %s539_s11, %s764_s11   ;;  %s507_s10 = sphi %s537_s10, %s763_s10   ;;  %s503_s9 = sphi %s535_s9, %s762_s9  }
   0x8   : > { %s560_s15 = sadd.s32 1, %s515_s12   ;;  %s28_s16 = sadd.s32 1, %s511_s11 }
   0x9   : > { %s25_s17 = ssub.s32 %s515_s12, %s560_s15  ;;  %p35_p0 = scmp.ne.s32.totalorder %s511_s11, %s507_s10 }
   0xa   : > { %p26_p1 = scmp.eq.s32.totalorder %s25_s17, 0  ;;  %p36_p2 = scmp.eq.s32.totalorder %s515_s12, 0 }
   0xb   : > { %p41_p3 = scmp.ne.s32.totalorder %s507_s10, %s503_s9  ;;  %p42_p4 = scmp.eq.s32.totalorder %s556_s13, 0 }
   0xc   : > { %s572_s18 = scalar_select %p26_p1, %s511_s11, %s28_s16  }
   0xd   : > { %p574_p5 = por %p36_p2, %p35_p0  ;;  %p578_p6 = por %p42_p4, %p41_p3 }
   0xe   : > { %p91_p7 = scmp.eq.s32.totalorder %s556_s13, 1  ;;  %p97_p8 = scmp.eq.s32.totalorder %s319_s14, 1 }
   0xf   : > { %s750_s20 = scalar_select %p578_p6, 1, 0 }
  0x10   : > { %p351_p10 = scmp.lt.s32.totalorder %s515_s12, 2  ;;  %p585_p11 = por %p91_p7, %p35_p0 }
  0x11   : > { %p589_p12 = por %p97_p8, %p41_p3  ;;  %s594_s23 = sand.u32 1, %s511_s11  }
  0x12   : > { %s751_s21 = scalar_select %p585_p11, 1, 0 }
  0x13   : > { %s752_s22 = scalar_select %p589_p12, 1, 0 }
  0x14   : > { %s323_s24 = sshll.u32 %s515_s12, 7  ;;  %s322_s25 = sshll.u32 %s594_s23, 3 }
  0x15   : > { %s603_s28 = scalar_lea.hbm %s744_s0, %s323_s24  ;;  %s121_s29 = scalar_lea.vmem [#allocation2], %s322_s25 }
  0x16   : > { %s128_s30 = sshll.u32 %s121_s29, 4  ;;  %p609_p13 = pnand %p351_p10, %p574_p5  ;;  %s613_s30 = int_to_ptr.vmem [resolvable:$true] %s128_s30 }
  0x17   : > { %s118_s4 = scalar_lea.sflag [#allocation3], %s594_s23  ;;  %s385_s5 = scalar_lea.hbm %s603_s28, 128 }
  0x18   : > { %p386_p2 = scmp.ne.s32.totalorder %s603_s28, %s385_s5  ;;  %p387_p3 = pneg %p609_p13 }
  0x19   : > { %s390_s8 = scalar_lea.hbm %s744_s0, 256  ;;  %p391_p5 = scmp.lt.u32.totalorder %s603_s28, %s744_s0 }
  0x1a   : > { %p388_p4 = pnand %p387_p3, %p386_p2  ;;  %p392_p8 = scmp.lt.u32.totalorder %s390_s8, %s385_s5 }
  0x1b   : > { %p394_p9 = scmp.lt.u32.totalorder %s385_s5, %s603_s28 }
  0x1c   : > { %p389_p7 = pneg %p388_p4  ;;  %p393_p10 = por %p392_p8, %p391_p5 }
  0x1e   : > { %p395_p0 = por %p394_p9, %p393_p10 }
  0x20   : > { %p396_p1 = pnand %p395_p0, %p389_p7 }
  0x22   : > { %399 = shalt.err (!%p396_p1)
}
  0x23   : > { %s400_s17 = scalar_lea.vmem %s613_s30, 128  ;;  %s517_s19 = smov [#allocation2]  }
  0x24   : > { %p401_p2 = scmp.ne.s32.totalorder %s613_s30, %s400_s17  ;;  %s405_s26 = sshll.u32 %s517_s19, 4  ;;  %s406_s26 = int_to_ptr.vmem [resolvable:$false] %s405_s26 }
  0x25   : > { %s407_s27 = scalar_lea.vmem %s406_s26, 256  ;;  %p408_p11 = scmp.lt.s32.totalorder %s613_s30, %s406_s26 }
  0x26   : > { %p403_p4 = pnand %p401_p2, %p387_p3  ;;  %p409_p5 = scmp.lt.s32.totalorder %s407_s27, %s400_s17 }
  0x28   : > { %p404_p12 = pneg %p403_p4  ;;  %p410_p8 = por %p409_p5, %p408_p11 }
  0x2a   : > { %p411_p9 = pnand %p410_p8, %p404_p12 }
  0x2c   : > { %414 = shalt.err (!%p411_p9)
}
  0x2d   : > { %343 = dma.hbm_to_vmem [thread:$0]  (!%p609_p13), %s603_s28, 128, %s613_s30, %s118_s4  }
  0x2e   : > { %p754_p0 = scmp.lt.s32.totalorder %s515_s12, 3  ;;  %p755_p1 = scmp.ge.s32.totalorder %s515_s12, 1 }
  0x2f   : > { %s656_s7 = scalar_lea.hbm %s745_s1, %s323_s24  ;;  %s139_s8 = scalar_lea.vmem [#allocation5], %s322_s25 }
  0x30   : > { %p647_p7 = pnand %p755_p1, %p754_p0  ;;  %s146_s14 = sshll.u32 %s139_s8, 4  ;;  %s147_s14 = int_to_ptr.vmem [resolvable:$true] %s146_s14 }
  0x31   : > { %s136_s28 = scalar_lea.sflag [#allocation6], %s594_s23  ;;  %s415_s30 = scalar_lea.hbm %s656_s7, 128 }
  0x32   : > { %s756_s29 = scalar_select %p647_p7, 1, 0 }
  0x33   : > { %p416_p11 = scmp.ne.s32.totalorder %s656_s7, %s415_s30  ;;  %s420_s24 = scalar_lea.hbm %s745_s1, 256 }
  0x34   : > { %p421_p2 = scmp.lt.u32.totalorder %s656_s7, %s745_s1  ;;  %p422_p4 = scmp.lt.u32.totalorder %s420_s24, %s415_s30 }
  0x35   : > { %p418_p12 = pnand %p416_p11, %p387_p3  ;;  %p424_p8 = scmp.lt.u32.totalorder %s415_s30, %s656_s7 }
  0x36   : > { %p423_p5 = por %p422_p4, %p421_p2 }
  0x37   : > { %p419_p10 = pneg %p418_p12 }
  0x38   : > { %p425_p9 = por %p424_p8, %p423_p5 }
  0x3a   : > { %p426_p0 = pnand %p425_p9, %p419_p10 }
  0x3c   : > { %429 = shalt.err (!%p426_p0)
}
  0x3d   : > { %s430_s23 = scalar_lea.vmem %s147_s14, 128  ;;  %s518_s25 = smov [#allocation5]  }
  0x3e   : > { %p431_p1 = scmp.ne.s32.totalorder %s147_s14, %s430_s23  ;;  %s435_s26 = sshll.u32 %s518_s25, 4  ;;  %s436_s26 = int_to_ptr.vmem [resolvable:$false] %s435_s26 }
  0x3f   : > { %s437_s27 = scalar_lea.vmem %s436_s26, 256  ;;  %p438_p6 = scmp.lt.s32.totalorder %s147_s14, %s436_s26 }
  0x40   : > { %p433_p11 = pnand %p431_p1, %p387_p3  ;;  %p439_p7 = scmp.lt.s32.totalorder %s437_s27, %s430_s23 }
  0x42   : > { %p434_p12 = pneg %p433_p11  ;;  %p440_p2 = por %p439_p7, %p438_p6 }
  0x44   : > { %p441_p4 = pnand %p440_p2, %p434_p12 }
  0x46   : > { %444 = shalt.err (!%p441_p4)
}
  0x47   : > { %346 = dma.hbm_to_vmem [thread:$0]  (!%p609_p13), %s656_s7, 128, %s147_s14, %s136_s28  }
  0x48   : > { %p757_p10 = scmp.ne.s32.totalorder %s756_s29, 0 }
  0x49   : > { %s683_s5 = sand.u32 (!%p757_p10), 1, %s507_s10   ;;  %p758_p3 = scmp.ne.s32.totalorder (!%p757_p10), %s750_s20, 0 }
  0x4a   : > { %155 = sbr.rel (%p757_p10) target bundleno = 111 (0x6f), region = 28  ;;  %s327_s6 = sshll.u32 (!%p757_p10), %s683_s5, 3 }
  0x4b   : > { %s158_s8 = scalar_lea.sflag (!%p757_p10), [#allocation3], %s683_s5  ;;  %s161_s30 = scalar_lea.vmem (!%p757_p10), [#allocation2], %s327_s6 }
  0x51   : > { %490 = dma.done.wait (%p758_p3), %s158_s8, 128  }
  0x52   : > { %492 = vsyncadd (%p758_p3), %s158_s8, 4294967168  ;;  %s167_s3 = scalar_lea.sflag [#allocation6], %s683_s5  ;;  %s170_s7 = scalar_lea.vmem [#allocation5], %s327_s6 }
  0x53   : > { %494 = dma.done.wait (%p758_p3), %s167_s3, 128  }
  0x54   : > { %496 = vsyncadd (%p758_p3), %s167_s3, 4294967168  ;;  %v196_v0 = vld [vmem:[%s161_s30] sm:$0xff]  ;;  %v197_v1 = vld [vmem:[%s170_s7] sm:$0xff]  ;;  %s195_s29 = scalar_lea.vmem [#allocation7], %s327_s6  ;;  %s331_s28 = sshll.u32 %s556_s13, 7 }
  0x55   : > { %v198_v2 = vsub.f32 %v196_v0, %v197_v1  ;;  %v204_v3 = vmul.f32 %v196_v0, %v196_v0  ;;  %v207_v6 = vand.u32 2147483647, %v196_v0  ;;  %s226_s14 = sshll.u32 %s195_s29, 4  ;;  %s702_s16 = scalar_lea.hbm %s746_s2, %s331_s28  ;;  %s697_s14 = int_to_ptr.vmem [resolvable:$true] %s226_s14 }
  0x56   : > { %s213_s24 = scalar_lea.sflag [#allocation4], %s683_s5  ;;  %s445_s17 = scalar_lea.vmem %s697_s14, 128 }
  0x57   : > { %v199_v4 = vmul.f32 %v198_v2, %v198_v2  ;;  %v201_v5 = vand.u32 2147483647, %v198_v2  ;;  %v205_v9 = vmul.f32 0.125, %v204_v3  ;;  %v208_v11 = vmul.f32 0.25, %v207_v6  ;;  %p446_p6 = scmp.ne.s32.totalorder %s697_s14, %s445_s17  ;;  %p759_p13 = scmp.ne.s32.totalorder %s751_s21, 0 }
  0x58   : > { %s519_s13 = smov [#allocation7]  }
  0x59   : > { %v200_v7 = vmul.f32 0.001953125, %v199_v4  ;;  %v202_v8 = vmul.f32 0.00390625, %v201_v5  ;;  %p447_p7 = pnand %p446_p6, %p759_p13  ;;  %s449_s19 = sshll.u32 %s519_s13, 4  ;;  %s450_s19 = int_to_ptr.vmem [resolvable:$false] %s449_s19 }
  0x5a   : > { %s451_s23 = scalar_lea.vmem %s450_s19, 256  ;;  %p452_p8 = scmp.lt.s32.totalorder %s697_s14, %s450_s19 }
  0x5b   : > { %v203_v10 = vadd.f32 %v202_v8, %v200_v7  ;;  %p448_p5 = pneg %p447_p7  ;;  %p453_p9 = scmp.lt.s32.totalorder %s451_s23, %s445_s17 }
  0x5d   : > { %v206_v12 = vadd.f32 %v205_v9, %v203_v10  ;;  %p454_p0 = por %p453_p9, %p452_p8 }
  0x5f   : > { %v209_v13 = vadd.f32 %v208_v11, %v206_v12  ;;  %p455_p1 = pnand %p454_p0, %p448_p5 }
  0x61   : > { %211 = vst [vmem:[%s195_s29] sm:$0xff] %v209_v13 }
  0x62   : > { %458 = shalt.err (!%p455_p1)
}
  0x63   : > { %s459_s25 = scalar_lea.hbm %s702_s16, 128  ;;  %s463_s5 = scalar_lea.hbm %s746_s2, 256 }
  0x64   : > { %p460_p11 = scmp.ne.s32.totalorder %s702_s16, %s459_s25  ;;  %p464_p4 = scmp.lt.u32.totalorder %s702_s16, %s746_s2 }
  0x65   : > { %p465_p10 = scmp.lt.u32.totalorder %s463_s5, %s459_s25  ;;  %p467_p6 = scmp.lt.u32.totalorder %s459_s25, %s702_s16 }
  0x66   : > { %p461_p12 = pnand %p460_p11, %p759_p13 }
  0x67   : > { %p466_p3 = por %p465_p10, %p464_p4 }
  0x68   : > { %p462_p2 = pneg %p461_p12 }
  0x69   : > { %p468_p7 = por %p467_p6, %p466_p3 }
  0x6b   : > { %p469_p5 = pnand %p468_p7, %p462_p2 }
  0x6d   : > { %472 = shalt.err (!%p469_p5)
}
  0x6e   : > { %338 = dma.vmem_to_hbm [thread:$0]  (%p759_p13), %s697_s14, 128, %s702_s16, %s213_s24  }
  0x6f PF: > { %s238_s30 = sand.u32 1, %s503_s9   ;;  %p760_p8 = scmp.ne.s32.totalorder %s752_s22, 0 }
  0x70   : > { %p761_p9 = scmp.ge.s32.totalorder %s515_s12, 2  ;;  %s239_s3 = scalar_lea.sflag [#allocation4], %s238_s30 }
  0x72   : > { %p348_p0 = pnand %p761_p9, %p760_p8 }
  0x74   : > { %498 = dma.done.wait (!%p348_p0), %s239_s3, 128  }
  0x75   : > { %500 = vsyncadd (!%p348_p0), %s239_s3, 4294967168  ;;  %p18_p1 = scmp.ge.s32.totalorder %s560_s15, 4   ;;  %s762_s9 = smov %s507_s10 }
  0x76   : > { %s763_s10 = smov %s511_s11  ;;  %s764_s11 = smov %s572_s18 }
  0x77   : > { %s765_s12 = smov %s560_s15  ;;  %20 = sbr.rel (!%p18_p1) target bundleno = 7 (0x7), region = 86 }
  0x7e   :  { %244 = vsyncpa [#allocation3], 1 }
  0x7f   :  { %246 = vsyncpa [#allocation3 + $0x1], 1 }
  0x80   :  { %247 = vsyncpa [#allocation6], 1 }
  0x81   :  { %249 = vsyncpa [#allocation6 + $0x1], 1 }
  0x82   :  { %250 = vsyncpa [#allocation4], 1 }
  0x83   :  { %252 = vsyncpa [#allocation4 + $0x1], 1 }

</bundles_post_ra>
